<compile_context>
chip_gen: v7x
topology: tpu7x:2x2x1
jax: 0.10.0
libtpu: 0.0.40
codegen_flags: <defaults>
</compile_context>

<pallas_src>
import functools

import jax
import jax.numpy as jnp
from jax import lax
from jax.experimental import pallas as pl
from jax.experimental.pallas import tpu as pltpu

EPS = 1e-5


# ----------------------------------------------------------------------------
# Pallas kernel
# ----------------------------------------------------------------------------
def _bn_apply(y, gamma, beta, *, relu):
    """Training-mode BatchNorm over axis 0 of a (M, C) tensor.

    Single-pass statistics (sum / sum-of-squares) fused into the matmul
    epilogue; biased variance, eps=1e-5 (PyTorch BatchNorm1d semantics).
    """
    inv_m = 1.0 / y.shape[0]
    s = jnp.sum(y, axis=0, keepdims=True)
    ss = jnp.sum(y * y, axis=0, keepdims=True)
    mean = s * inv_m
    var = ss * inv_m - mean * mean
    out = (y - mean) * lax.rsqrt(var + EPS) * gamma + beta
    if relu:
        out = jnp.maximum(out, 0.0)
    return out


def _tap(x_pad_ref, k, l_out, stride):
    """k-th 3-tap conv window, stride folded into a strided VMEM read."""
    if stride == 1:
        return x_pad_ref[:, k:k + l_out, :]
    return x_pad_ref[:, pl.ds(k, l_out, stride=stride), :]


def _basic_block_kernel(n, l_out, stride, use_ds, *refs):
    if use_ds:
        (x_pad_ref, w1_ref, g1_ref, b1_ref, w2_ref, g2_ref, b2_ref,
         wd_ref, gd_ref, bd_ref, o_ref, hpad_ref) = refs
    else:
        (x_pad_ref, w1_ref, g1_ref, b1_ref, w2_ref, g2_ref, b2_ref,
         o_ref, hpad_ref) = refs

    cin = x_pad_ref.shape[-1]
    cout = o_ref.shape[-1]
    m = n * l_out

    # ---- conv1: one MXU pass, M = N*Lout, K = 3*Cin --------------------------
    taps1 = jnp.concatenate(
        [_tap(x_pad_ref, k, l_out, stride) for k in range(3)], axis=-1)
    a1 = taps1.reshape(m, 3 * cin)
    y1 = jnp.dot(a1, w1_ref[...], preferred_element_type=jnp.float32)

    # ---- bn1 + relu (fused single-pass stats) --------------------------------
    h = _bn_apply(y1, g1_ref[...], b1_ref[...], relu=True)          # (M, Cout)

    # ---- conv2: zero-edged VMEM scratch instead of concatenate-padding -------
    zrow = jnp.zeros((n, 1, cout), jnp.float32)
    hpad_ref[:, 0:1, :] = zrow
    hpad_ref[:, l_out + 1:l_out + 2, :] = zrow
    hpad_ref[:, 1:l_out + 1, :] = h.reshape(n, l_out, cout)
    taps2 = jnp.concatenate(
        [hpad_ref[:, k:k + l_out, :] for k in range(3)], axis=-1)   # (N,Lout,3Cout)
    a2 = taps2.reshape(m, 3 * cout)
    y2 = jnp.dot(a2, w2_ref[...], preferred_element_type=jnp.float32)

    # ---- bn2 ------------------------------------------------------------------
    y2 = _bn_apply(y2, g2_ref[...], b2_ref[...], relu=False)

    # ---- identity / downsample (re-uses the already-resident x_pad block) ----
    x_id = _tap(x_pad_ref, 1, l_out, stride).reshape(m, cin)
    if use_ds:
        idy = jnp.dot(x_id, wd_ref[...], preferred_element_type=jnp.float32)
        idy = _bn_apply(idy, gd_ref[...], bd_ref[...], relu=False)
    else:
        idy = x_id  # cin == cout here

    # ---- residual add + relu --------------------------------------------------
    o_ref[...] = jnp.maximum(y2 + idy, 0.0).astype(o_ref.dtype)


def _zero_index(ndim, i):
    return (0,) * ndim


# ----------------------------------------------------------------------------
# Wrapper (layout transposes, single zero-pad, pallas_call plumbing)
# ----------------------------------------------------------------------------
def basic_block_1d(x, params, stride, *, compute_dtype=jnp.float32):
    """x: (N, C_in, L) float32 -> (N, C_out, L_out) float32."""
    N, Cin, L = x.shape
    Cout = params["w1"].shape[2]
    Lout = (L - 1) // stride + 1
    use_ds = (stride != 1) or (Cin != Cout)
    M = N * Lout

    # Channels-last + single zero-padded copy of the input (no 3x im2col).
    x_nlc = jnp.transpose(x, (0, 2, 1)).astype(compute_dtype)
    x_pad = jnp.pad(x_nlc, ((0, 0), (1, 1), (0, 0)))                 # (N, L+2, Cin)

    # Conv weights flattened so each conv is one K = 3*C matmul.
    w1f = params["w1"].reshape(3 * Cin, Cout).astype(compute_dtype)  # (3Cin, Cout)
    w2f = params["w2"].reshape(3 * Cout, Cout).astype(compute_dtype)
    bc = lambda a: a.reshape(1, -1).astype(jnp.float32)

    inputs = [x_pad, w1f, bc(params["g1"]), bc(params["b1"]),
              w2f, bc(params["g2"]), bc(params["b2"])]
    if use_ds:  # don't DMA dead downsample params on the identity-shortcut path
        inputs += [params["wd"].astype(compute_dtype),
                   bc(params["gd"]), bc(params["bd"])]

    flops = 2 * M * (3 * Cin) * Cout + 2 * M * (3 * Cout) * Cout
    if use_ds:
        flops += 2 * M * Cin * Cout
    bytes_accessed = int(sum(a.size * a.dtype.itemsize for a in inputs)
                         + M * Cout * 4)

    kernel = functools.partial(_basic_block_kernel, N, Lout, stride, use_ds)
    out_flat = pl.pallas_call(
        kernel,
        out_shape=jax.ShapeDtypeStruct((M, Cout), jnp.float32),
        grid=(1,),
        in_specs=[pl.BlockSpec(a.shape, functools.partial(_zero_index, a.ndim))
                  for a in inputs],
        out_specs=pl.BlockSpec((M, Cout), functools.partial(_zero_index, 2)),
        scratch_shapes=[pltpu.VMEM((N, Lout + 2, Cout), jnp.float32)],
        compiler_params=pltpu.CompilerParams(
            dimension_semantics=("arbitrary",),
            vmem_limit_bytes=32 * 1024 * 1024),
        cost_estimate=pl.CostEstimate(flops=flops,
                                      transcendentals=3 * Cout,
                                      bytes_accessed=bytes_accessed),
    )(*inputs)

    out_nlc = out_flat.reshape(N, Lout, Cout)
    return jnp.transpose(out_nlc, (0, 2, 1))                         # (N, Cout, Lout)


# ----------------------------------------------------------------------------
# Deterministic parameter initialization (shapes from BasicBlock1D.__init__)
# ----------------------------------------------------------------------------
def init_params(key, cin, cout):
    ks = jax.random.split(key, 9)
    s1 = 1.0 / (cin * 3) ** 0.5
    s2 = 1.0 / (cout * 3) ** 0.5
    sd = 1.0 / cin ** 0.5
    u = lambda k, shape, lo, hi: jax.random.uniform(k, shape, jnp.float32, lo, hi)
    return dict(
        w1=u(ks[0], (3, cin, cout), -s1, s1),    # (K, Cin, Cout)
        g1=u(ks[1], (cout,), 0.5, 1.5),
        b1=u(ks[2], (cout,), -0.5, 0.5),
        w2=u(ks[3], (3, cout, cout), -s2, s2),
        g2=u(ks[4], (cout,), 0.5, 1.5),
        b2=u(ks[5], (cout,), -0.5, 0.5),
        wd=u(ks[6], (cin, cout), -sd, sd),
        gd=u(ks[7], (cout,), 0.5, 1.5),
        bd=u(ks[8], (cout,), -0.5, 0.5),
    )


# ----------------------------------------------------------------------------
# Plain-JAX reference (mirrors the PyTorch forward) for verification
# ----------------------------------------------------------------------------
def reference(x, params, stride):
    def conv1d(x_ncl, w_kio, s, pad):
        w = jnp.transpose(w_kio, (2, 1, 0))  # -> (Cout, Cin, K)
        return lax.conv_general_dilated(
            x_ncl, w, window_strides=(s,), padding=[(pad, pad)],
            dimension_numbers=("NCH", "OIH", "NCH"))

    def bn(y, gamma, beta):
        mean = jnp.mean(y, axis=(0, 2), keepdims=True)
        var = jnp.mean((y - mean) ** 2, axis=(0, 2), keepdims=True)
        return ((y - mean) / jnp.sqrt(var + EPS)
                * gamma[None, :, None] + beta[None, :, None])

    cin, cout = x.shape[1], params["w1"].shape[2]
    out = jax.nn.relu(bn(conv1d(x, params["w1"], stride, 1),
                         params["g1"], params["b1"]))
    out = bn(conv1d(out, params["w2"], 1, 1), params["g2"], params["b2"])
    identity = x
    if stride != 1 or cin != cout:
        identity = bn(conv1d(x, params["wd"][None, :, :], stride, 0),
                      params["gd"], params["bd"])
    return jax.nn.relu(out + identity)


if __name__ == "__main__":
    key = jax.random.PRNGKey(0)
    kx, kp1, kp2 = jax.random.split(key, 3)

    # Config 1: stride=2, channel change -> exercises the downsample branch.
    N, Cin, Cout, L, stride = 2, 4, 8, 16, 2
    x = jax.random.normal(kx, (N, Cin, L), jnp.float32)
    p1 = init_params(kp1, Cin, Cout)
    out1 = jax.block_until_ready(basic_block_1d(x, p1, stride))
    ref1 = reference(x, p1, stride)
    assert out1.shape == (N, Cout, (L - 1) // stride + 1)
    assert jnp.allclose(out1, ref1, atol=3e-4, rtol=1e-3), \
        f"max err {jnp.max(jnp.abs(out1 - ref1))}"

    # Config 2: stride=1, same channels -> plain identity shortcut.
    p2 = init_params(kp2, Cin, Cin)
    out2 = jax.block_until_ready(basic_block_1d(x, p2, 1))
    ref2 = reference(x, p2, 1)
    assert out2.shape == (N, Cin, L)
    assert jnp.allclose(out2, ref2, atol=3e-4, rtol=1e-3), \
        f"max err {jnp.max(jnp.abs(out2 - ref2))}"

    print("KERNEL_OK")
</pallas_src>

<mosaic_0001>
module attributes {stable_mosaic.version = 11 : i64} {
  func.func @_basic_block_kernel(%arg0: i32, %arg1: memref<2x18x4xf32, #tpu.memory_space<vmem>>, %arg2: memref<12x8xf32, #tpu.memory_space<vmem>>, %arg3: memref<1x8xf32, #tpu.memory_space<vmem>>, %arg4: memref<1x8xf32, #tpu.memory_space<vmem>>, %arg5: memref<24x8xf32, #tpu.memory_space<vmem>>, %arg6: memref<1x8xf32, #tpu.memory_space<vmem>>, %arg7: memref<1x8xf32, #tpu.memory_space<vmem>>, %arg8: memref<4x8xf32, #tpu.memory_space<vmem>>, %arg9: memref<1x8xf32, #tpu.memory_space<vmem>>, %arg10: memref<1x8xf32, #tpu.memory_space<vmem>>, %arg11: memref<16x8xf32, #tpu.memory_space<vmem>>, %arg12: memref<2x10x8xf32, #tpu.memory_space<vmem>>) attributes {dimension_semantics = [#tpu.dimension_semantics<arbitrary>], iteration_bounds = array<i64: 1>, scalar_prefetch = 0 : i64, scratch_operands = 1 : i64, tpu.core_type = #tpu.core_type<tc>, window_params = [{pipeline_mode = #tpu.pipeline_mode<synchronous>, transform_indices = @transform_0, window_bounds = array<i64: 2, 18, 4>}, {pipeline_mode = #tpu.pipeline_mode<synchronous>, transform_indices = @transform_1, window_bounds = array<i64: 12, 8>}, {pipeline_mode = #tpu.pipeline_mode<synchronous>, transform_indices = @transform_2, window_bounds = array<i64: 1, 8>}, {pipeline_mode = #tpu.pipeline_mode<synchronous>, transform_indices = @transform_3, window_bounds = array<i64: 1, 8>}, {pipeline_mode = #tpu.pipeline_mode<synchronous>, transform_indices = @transform_4, window_bounds = array<i64: 24, 8>}, {pipeline_mode = #tpu.pipeline_mode<synchronous>, transform_indices = @transform_5, window_bounds = array<i64: 1, 8>}, {pipeline_mode = #tpu.pipeline_mode<synchronous>, transform_indices = @transform_6, window_bounds = array<i64: 1, 8>}, {pipeline_mode = #tpu.pipeline_mode<synchronous>, transform_indices = @transform_7, window_bounds = array<i64: 4, 8>}, {pipeline_mode = #tpu.pipeline_mode<synchronous>, transform_indices = @transform_8, window_bounds = array<i64: 1, 8>}, {pipeline_mode = #tpu.pipeline_mode<synchronous>, transform_indices = @transform_9, window_bounds = array<i64: 1, 8>}, {pipeline_mode = #tpu.pipeline_mode<synchronous>, transform_indices = @transform_10, window_bounds = array<i64: 16, 8>}]} {
    %c0 = arith.constant 0 : index
    %c0_0 = arith.constant 0 : index
    %c0_1 = arith.constant 0 : index
    %0 = tpu.strided_load %arg1[%c0, %c0_0, %c0_1] {strides = array<i32: 1, 2, 1>} : memref<2x18x4xf32, #tpu.memory_space<vmem>>, vector<2x8x4xf32>
    %c0_2 = arith.constant 0 : index
    %c1 = arith.constant 1 : index
    %c0_3 = arith.constant 0 : index
    %1 = tpu.strided_load %arg1[%c0_2, %c1, %c0_3] {strides = array<i32: 1, 2, 1>} : memref<2x18x4xf32, #tpu.memory_space<vmem>>, vector<2x8x4xf32>
    %c0_4 = arith.constant 0 : index
    %c2 = arith.constant 2 : index
    %c0_5 = arith.constant 0 : index
    %2 = tpu.strided_load %arg1[%c0_4, %c2, %c0_5] {strides = array<i32: 1, 2, 1>} : memref<2x18x4xf32, #tpu.memory_space<vmem>>, vector<2x8x4xf32>
    %3 = tpu.concatenate %0, %1, %2 in 2 : vector<2x8x4xf32>, vector<2x8x4xf32>, vector<2x8x4xf32> -> vector<2x8x12xf32>
    %4 = vector.shape_cast %3 : vector<2x8x12xf32> to vector<16x12xf32>
    %c0_6 = arith.constant 0 : index
    %c0_7 = arith.constant 0 : index
    %5 = vector.load %arg2[%c0_6, %c0_7] : memref<12x8xf32, #tpu.memory_space<vmem>>, vector<12x8xf32>
    %cst = arith.constant dense<0.000000e+00> : vector<16x8xf32>
    %6 = tpu.matmul %4, %5, %cst {dimension_numbers = #tpu.dot_dimension_numbers<[1], [0], [0], [1], [0, 0, 1, 1], [], []>} : vector<16x12xf32>, vector<12x8xf32>, vector<16x8xf32> -> vector<16x8xf32>
    %c0_8 = arith.constant 0 : index
    %c0_9 = arith.constant 0 : index
    %7 = vector.load %arg3[%c0_8, %c0_9] : memref<1x8xf32, #tpu.memory_space<vmem>>, vector<1x8xf32>
    %c0_10 = arith.constant 0 : index
    %c0_11 = arith.constant 0 : index
    %8 = vector.load %arg4[%c0_10, %c0_11] : memref<1x8xf32, #tpu.memory_space<vmem>>, vector<1x8xf32>
    %cst_12 = arith.constant dense<0.000000e+00> : vector<8xf32>
    %9 = vector.multi_reduction <add>, %6, %cst_12 [0] : vector<16x8xf32> to vector<8xf32>
    %10 = vector.shape_cast %9 : vector<8xf32> to vector<1x8xf32>
    %11 = arith.mulf %6, %6 : vector<16x8xf32>
    %cst_13 = arith.constant dense<0.000000e+00> : vector<8xf32>
    %12 = vector.multi_reduction <add>, %11, %cst_13 [0] : vector<16x8xf32> to vector<8xf32>
    %13 = vector.shape_cast %12 : vector<8xf32> to vector<1x8xf32>
    %cst_14 = arith.constant 6.250000e-02 : f32
    %14 = vector.broadcast %cst_14 : f32 to vector<1x8xf32>
    %15 = arith.mulf %10, %14 : vector<1x8xf32>
    %cst_15 = arith.constant 6.250000e-02 : f32
    %16 = vector.broadcast %cst_15 : f32 to vector<1x8xf32>
    %17 = arith.mulf %13, %16 : vector<1x8xf32>
    %18 = arith.mulf %15, %15 : vector<1x8xf32>
    %19 = arith.subf %17, %18 : vector<1x8xf32>
    %20 = vector.broadcast %15 : vector<1x8xf32> to vector<16x8xf32>
    %21 = arith.subf %6, %20 : vector<16x8xf32>
    %cst_16 = arith.constant 9.99999974E-6 : f32
    %22 = vector.broadcast %cst_16 : f32 to vector<1x8xf32>
    %23 = arith.addf %19, %22 : vector<1x8xf32>
    %24 = math.rsqrt %23 : vector<1x8xf32>
    %25 = vector.broadcast %24 : vector<1x8xf32> to vector<16x8xf32>
    %26 = arith.mulf %21, %25 : vector<16x8xf32>
    %27 = vector.broadcast %7 : vector<1x8xf32> to vector<16x8xf32>
    %28 = arith.mulf %26, %27 : vector<16x8xf32>
    %29 = vector.broadcast %8 : vector<1x8xf32> to vector<16x8xf32>
    %30 = arith.addf %28, %29 : vector<16x8xf32>
    %cst_17 = arith.constant 0.000000e+00 : f32
    %31 = vector.broadcast %cst_17 : f32 to vector<16x8xf32>
    %32 = arith.maximumf %30, %31 : vector<16x8xf32>
    %cst_18 = arith.constant 0.000000e+00 : f32
    %33 = vector.broadcast %cst_18 : f32 to vector<2x1x8xf32>
    %c0_19 = arith.constant 0 : index
    %c0_20 = arith.constant 0 : index
    %c0_21 = arith.constant 0 : index
    %34 = vector.load %arg12[%c0_19, %c0_20, %c0_21] : memref<2x10x8xf32, #tpu.memory_space<vmem>>, vector<2x1x8xf32>
    tpu.vector_store %arg12[%c0_19, %c0_20, %c0_21], %33 {strides = array<i32>} : memref<2x10x8xf32, #tpu.memory_space<vmem>>, vector<2x1x8xf32>,
    %c0_22 = arith.constant 0 : index
    %c9 = arith.constant 9 : index
    %c0_23 = arith.constant 0 : index
    %35 = vector.load %arg12[%c0_22, %c9, %c0_23] : memref<2x10x8xf32, #tpu.memory_space<vmem>>, vector<2x1x8xf32>
    tpu.vector_store %arg12[%c0_22, %c9, %c0_23], %33 {strides = array<i32>} : memref<2x10x8xf32, #tpu.memory_space<vmem>>, vector<2x1x8xf32>,
    %36 = vector.shape_cast %32 : vector<16x8xf32> to vector<2x8x8xf32>
    %c0_24 = arith.constant 0 : index
    %c1_25 = arith.constant 1 : index
    %c0_26 = arith.constant 0 : index
    %37 = vector.load %arg12[%c0_24, %c1_25, %c0_26] : memref<2x10x8xf32, #tpu.memory_space<vmem>>, vector<2x8x8xf32>
    tpu.vector_store %arg12[%c0_24, %c1_25, %c0_26], %36 {strides = array<i32>} : memref<2x10x8xf32, #tpu.memory_space<vmem>>, vector<2x8x8xf32>,
    %c0_27 = arith.constant 0 : index
    %c0_28 = arith.constant 0 : index
    %c0_29 = arith.constant 0 : index
    %38 = vector.load %arg12[%c0_27, %c0_28, %c0_29] : memref<2x10x8xf32, #tpu.memory_space<vmem>>, vector<2x8x8xf32>
    %c0_30 = arith.constant 0 : index
    %c1_31 = arith.constant 1 : index
    %c0_32 = arith.constant 0 : index
    %39 = vector.load %arg12[%c0_30, %c1_31, %c0_32] : memref<2x10x8xf32, #tpu.memory_space<vmem>>, vector<2x8x8xf32>
    %c0_33 = arith.constant 0 : index
    %c2_34 = arith.constant 2 : index
    %c0_35 = arith.constant 0 : index
    %40 = vector.load %arg12[%c0_33, %c2_34, %c0_35] : memref<2x10x8xf32, #tpu.memory_space<vmem>>, vector<2x8x8xf32>
    %41 = tpu.concatenate %38, %39, %40 in 2 : vector<2x8x8xf32>, vector<2x8x8xf32>, vector<2x8x8xf32> -> vector<2x8x24xf32>
    %42 = vector.shape_cast %41 : vector<2x8x24xf32> to vector<16x24xf32>
    %c0_36 = arith.constant 0 : index
    %c0_37 = arith.constant 0 : index
    %43 = vector.load %arg5[%c0_36, %c0_37] : memref<24x8xf32, #tpu.memory_space<vmem>>, vector<24x8xf32>
    %cst_38 = arith.constant dense<0.000000e+00> : vector<16x8xf32>
    %44 = tpu.matmul %42, %43, %cst_38 {dimension_numbers = #tpu.dot_dimension_numbers<[1], [0], [0], [1], [0, 0, 1, 1], [], []>} : vector<16x24xf32>, vector<24x8xf32>, vector<16x8xf32> -> vector<16x8xf32>
    %c0_39 = arith.constant 0 : index
    %c0_40 = arith.constant 0 : index
    %45 = vector.load %arg6[%c0_39, %c0_40] : memref<1x8xf32, #tpu.memory_space<vmem>>, vector<1x8xf32>
    %c0_41 = arith.constant 0 : index
    %c0_42 = arith.constant 0 : index
    %46 = vector.load %arg7[%c0_41, %c0_42] : memref<1x8xf32, #tpu.memory_space<vmem>>, vector<1x8xf32>
    %cst_43 = arith.constant dense<0.000000e+00> : vector<8xf32>
    %47 = vector.multi_reduction <add>, %44, %cst_43 [0] : vector<16x8xf32> to vector<8xf32>
    %48 = vector.shape_cast %47 : vector<8xf32> to vector<1x8xf32>
    %49 = arith.mulf %44, %44 : vector<16x8xf32>
    %cst_44 = arith.constant dense<0.000000e+00> : vector<8xf32>
    %50 = vector.multi_reduction <add>, %49, %cst_44 [0] : vector<16x8xf32> to vector<8xf32>
    %51 = vector.shape_cast %50 : vector<8xf32> to vector<1x8xf32>
    %cst_45 = arith.constant 6.250000e-02 : f32
    %52 = vector.broadcast %cst_45 : f32 to vector<1x8xf32>
    %53 = arith.mulf %48, %52 : vector<1x8xf32>
    %cst_46 = arith.constant 6.250000e-02 : f32
    %54 = vector.broadcast %cst_46 : f32 to vector<1x8xf32>
    %55 = arith.mulf %51, %54 : vector<1x8xf32>
    %56 = arith.mulf %53, %53 : vector<1x8xf32>
    %57 = arith.subf %55, %56 : vector<1x8xf32>
    %58 = vector.broadcast %53 : vector<1x8xf32> to vector<16x8xf32>
    %59 = arith.subf %44, %58 : vector<16x8xf32>
    %cst_47 = arith.constant 9.99999974E-6 : f32
    %60 = vector.broadcast %cst_47 : f32 to vector<1x8xf32>
    %61 = arith.addf %57, %60 : vector<1x8xf32>
    %62 = math.rsqrt %61 : vector<1x8xf32>
    %63 = vector.broadcast %62 : vector<1x8xf32> to vector<16x8xf32>
    %64 = arith.mulf %59, %63 : vector<16x8xf32>
    %65 = vector.broadcast %45 : vector<1x8xf32> to vector<16x8xf32>
    %66 = arith.mulf %64, %65 : vector<16x8xf32>
    %67 = vector.broadcast %46 : vector<1x8xf32> to vector<16x8xf32>
    %68 = arith.addf %66, %67 : vector<16x8xf32>
    %c0_48 = arith.constant 0 : index
    %c1_49 = arith.constant 1 : index
    %c0_50 = arith.constant 0 : index
    %69 = tpu.strided_load %arg1[%c0_48, %c1_49, %c0_50] {strides = array<i32: 1, 2, 1>} : memref<2x18x4xf32, #tpu.memory_space<vmem>>, vector<2x8x4xf32>
    %70 = vector.shape_cast %69 : vector<2x8x4xf32> to vector<16x4xf32>
    %c0_51 = arith.constant 0 : index
    %c0_52 = arith.constant 0 : index
    %71 = vector.load %arg8[%c0_51, %c0_52] : memref<4x8xf32, #tpu.memory_space<vmem>>, vector<4x8xf32>
    %cst_53 = arith.constant dense<0.000000e+00> : vector<16x8xf32>
    %72 = tpu.matmul %70, %71, %cst_53 {dimension_numbers = #tpu.dot_dimension_numbers<[1], [0], [0], [1], [0, 0, 1, 1], [], []>} : vector<16x4xf32>, vector<4x8xf32>, vector<16x8xf32> -> vector<16x8xf32>
    %c0_54 = arith.constant 0 : index
    %c0_55 = arith.constant 0 : index
    %73 = vector.load %arg9[%c0_54, %c0_55] : memref<1x8xf32, #tpu.memory_space<vmem>>, vector<1x8xf32>
    %c0_56 = arith.constant 0 : index
    %c0_57 = arith.constant 0 : index
    %74 = vector.load %arg10[%c0_56, %c0_57] : memref<1x8xf32, #tpu.memory_space<vmem>>, vector<1x8xf32>
    %cst_58 = arith.constant dense<0.000000e+00> : vector<8xf32>
    %75 = vector.multi_reduction <add>, %72, %cst_58 [0] : vector<16x8xf32> to vector<8xf32>
    %76 = vector.shape_cast %75 : vector<8xf32> to vector<1x8xf32>
    %77 = arith.mulf %72, %72 : vector<16x8xf32>
    %cst_59 = arith.constant dense<0.000000e+00> : vector<8xf32>
    %78 = vector.multi_reduction <add>, %77, %cst_59 [0] : vector<16x8xf32> to vector<8xf32>
    %79 = vector.shape_cast %78 : vector<8xf32> to vector<1x8xf32>
    %cst_60 = arith.constant 6.250000e-02 : f32
    %80 = vector.broadcast %cst_60 : f32 to vector<1x8xf32>
    %81 = arith.mulf %76, %80 : vector<1x8xf32>
    %cst_61 = arith.constant 6.250000e-02 : f32
    %82 = vector.broadcast %cst_61 : f32 to vector<1x8xf32>
    %83 = arith.mulf %79, %82 : vector<1x8xf32>
    %84 = arith.mulf %81, %81 : vector<1x8xf32>
    %85 = arith.subf %83, %84 : vector<1x8xf32>
    %86 = vector.broadcast %81 : vector<1x8xf32> to vector<16x8xf32>
    %87 = arith.subf %72, %86 : vector<16x8xf32>
    %cst_62 = arith.constant 9.99999974E-6 : f32
    %88 = vector.broadcast %cst_62 : f32 to vector<1x8xf32>
    %89 = arith.addf %85, %88 : vector<1x8xf32>
    %90 = math.rsqrt %89 : vector<1x8xf32>
    %91 = vector.broadcast %90 : vector<1x8xf32> to vector<16x8xf32>
    %92 = arith.mulf %87, %91 : vector<16x8xf32>
    %93 = vector.broadcast %73 : vector<1x8xf32> to vector<16x8xf32>
    %94 = arith.mulf %92, %93 : vector<16x8xf32>
    %95 = vector.broadcast %74 : vector<1x8xf32> to vector<16x8xf32>
    %96 = arith.addf %94, %95 : vector<16x8xf32>
    %97 = arith.addf %68, %96 : vector<16x8xf32>
    %cst_63 = arith.constant 0.000000e+00 : f32
    %98 = vector.broadcast %cst_63 : f32 to vector<16x8xf32>
    %99 = arith.maximumf %97, %98 : vector<16x8xf32>
    %c0_64 = arith.constant 0 : index
    %c0_65 = arith.constant 0 : index
    %100 = vector.load %arg11[%c0_64, %c0_65] : memref<16x8xf32, #tpu.memory_space<vmem>>, vector<16x8xf32>
    tpu.vector_store %arg11[%c0_64, %c0_65], %99 {strides = array<i32>} : memref<16x8xf32, #tpu.memory_space<vmem>>, vector<16x8xf32>,
    return
  }
  func.func @transform_0(%arg0: i32) -> (i32, i32, i32) {
    %c0_i32 = arith.constant 0 : i32
    %c0_i32_0 = arith.constant 0 : i32
    %c0_i32_1 = arith.constant 0 : i32
    %c0_i32_2 = arith.constant 0 : i32
    return %c0_i32, %c0_i32_0, %c0_i32_1 : i32, i32, i32
  }
  func.func @transform_1(%arg0: i32) -> (i32, i32) {
    %c0_i32 = arith.constant 0 : i32
    %c0_i32_0 = arith.constant 0 : i32
    %c0_i32_1 = arith.constant 0 : i32
    return %c0_i32, %c0_i32_0 : i32, i32
  }
  func.func @transform_2(%arg0: i32) -> (i32, i32) {
    %c0_i32 = arith.constant 0 : i32
    %c0_i32_0 = arith.constant 0 : i32
    %c0_i32_1 = arith.constant 0 : i32
    return %c0_i32, %c0_i32_0 : i32, i32
  }
  func.func @transform_3(%arg0: i32) -> (i32, i32) {
    %c0_i32 = arith.constant 0 : i32
    %c0_i32_0 = arith.constant 0 : i32
    %c0_i32_1 = arith.constant 0 : i32
    return %c0_i32, %c0_i32_0 : i32, i32
  }
  func.func @transform_4(%arg0: i32) -> (i32, i32) {
    %c0_i32 = arith.constant 0 : i32
    %c0_i32_0 = arith.constant 0 : i32
    %c0_i32_1 = arith.constant 0 : i32
    return %c0_i32, %c0_i32_0 : i32, i32
  }
  func.func @transform_5(%arg0: i32) -> (i32, i32) {
    %c0_i32 = arith.constant 0 : i32
    %c0_i32_0 = arith.constant 0 : i32
    %c0_i32_1 = arith.constant 0 : i32
    return %c0_i32, %c0_i32_0 : i32, i32
  }
  func.func @transform_6(%arg0: i32) -> (i32, i32) {
    %c0_i32 = arith.constant 0 : i32
    %c0_i32_0 = arith.constant 0 : i32
    %c0_i32_1 = arith.constant 0 : i32
    return %c0_i32, %c0_i32_0 : i32, i32
  }
  func.func @transform_7(%arg0: i32) -> (i32, i32) {
    %c0_i32 = arith.constant 0 : i32
    %c0_i32_0 = arith.constant 0 : i32
    %c0_i32_1 = arith.constant 0 : i32
    return %c0_i32, %c0_i32_0 : i32, i32
  }
  func.func @transform_8(%arg0: i32) -> (i32, i32) {
    %c0_i32 = arith.constant 0 : i32
    %c0_i32_0 = arith.constant 0 : i32
    %c0_i32_1 = arith.constant 0 : i32
    return %c0_i32, %c0_i32_0 : i32, i32
  }
  func.func @transform_9(%arg0: i32) -> (i32, i32) {
    %c0_i32 = arith.constant 0 : i32
    %c0_i32_0 = arith.constant 0 : i32
    %c0_i32_1 = arith.constant 0 : i32
    return %c0_i32, %c0_i32_0 : i32, i32
  }
  func.func @transform_10(%arg0: i32) -> (i32, i32) {
    %c0_i32 = arith.constant 0 : i32
    %c0_i32_0 = arith.constant 0 : i32
    %c0_i32_1 = arith.constant 0 : i32
    return %c0_i32, %c0_i32_0 : i32, i32
  }
}

</mosaic_0001>

<bundles_post_ra>
// kernel: tpu_custom_call.1
= control target key start
LH: loop header
LB: loop body
LE: loop exit
PB: predicated region body
PF: predicated region fallthrough
CT: control target
= control target key end

     0   :  { %vm77_vm0 = vcmask 1043456   ;;  %s593_s17 = smov 4   ;;  %s594_s18 = smov 8   ;;  %vm595_vm1 = vmmov 1   ;;  %vm62_vm3 = vcmask 31744   ;;  %vm65_vm4 = vcmask 64512   ;;  %s750_s0 = inlined_call_operand.vmem [shape: f32[2,18,4], index: 0, kind: input, shape index: {}]   ;;  %s751_s1 = inlined_call_operand.vmem [shape: f32[12,8], index: 1, kind: input, shape index: {}]   ;;  %s752_s7 = inlined_call_operand.vmem [shape: f32[4,8], index: 7, kind: input, shape index: {}]   ;;  %s753_s2 = inlined_call_operand.vmem [shape: f32[1,8], index: 2, kind: input, shape index: {}]   ;;  %s754_s3 = inlined_call_operand.vmem [shape: f32[1,8], index: 3, kind: input, shape index: {}]   ;;  %s755_s4 = inlined_call_operand.vmem [shape: f32[24,8], index: 4, kind: input, shape index: {}]   ;;  %s756_s8 = inlined_call_operand.vmem [shape: f32[1,8], index: 8, kind: input, shape index: {}]   ;;  %s757_s5 = inlined_call_operand.vmem [shape: f32[1,8], index: 5, kind: input, shape index: {}]   ;;  %s758_s9 = inlined_call_operand.vmem [shape: f32[1,8], index: 9, kind: input, shape index: {}]   ;;  %s759_s6 = inlined_call_operand.vmem [shape: f32[1,8], index: 6, kind: input, shape index: {}]   ;;  %s760_s10 = inlined_call_operand.vmem [shape: f32[16,8], index: 10, kind: output, shape index: {}]  }
   0x1   :  { %v519_v0 = vld [vmem:[%s750_s0 + $0x1] ss:$2 sm:$0xff]  ;;  %v521_v1 = vld [vmem:[%s750_s0 + $0x2] ss:$2 sm:$0xff]  ;;  %vm573_vm2 = vmpackc.low %vm77_vm0, %vm595_vm1  ;;  %vm70_vm5 = vcmask 97280   ;;  %vm206_vm6 = vcmask 57344  }
   0x2   :  { %48 = vrot.lane.b32.xlu0 %v519_v0, %s593_s17  ;;  %56 = vrot.lane.b32.xlu1 %v521_v1, %s594_s18  ;;  %v520_v2 = vld [vmem:[%s750_s0 + $0x19] ss:$2 sm:$0xff]  ;;  %v522_v3 = vld [vmem:[%s750_s0 + $0x1a] ss:$2 sm:$0xff]  ;;  %v596_v17 = vmov 0.0   ;;  %vm237_vm7 = vcmask 130048  }
   0x3   :  { %v68_v4 = vld [vmem:[%s751_s1] sm:$0xff]  ;;  %v69_v5 = vld [vmem:[%s751_s1 + $0x8] sm:$0xf]  ;;  %210 = vst.msk [vmem:[#allocation2 + $0x19] sm:$0x1] %vm206_vm6, %v596_v17  ;;  %v242_v0 = vld [vmem:[%s755_s4 + $0x10] sm:$0xff] }
   0x4   :  { %v572_v6 = vpack.c.bf16 %v69_v5, %v68_v4  ;;  %v35_v7 = vld [vmem:[%s750_s0] ss:$2 sm:$0xff]  ;;  %207 = vst.msk [vmem:[#allocation2] sm:$0x1] %vm206_vm6, %v596_v17  ;;  %208 = vst.msk [vmem:[#allocation2 + $0x10] sm:$0x1] %vm206_vm6, %v596_v17 }
   0x5   :  { %v518_v12 = vld [vmem:[%s750_s0 + $0x18] ss:$2 sm:$0xff]  ;;  %209 = vst.msk [vmem:[#allocation2 + $0x9] sm:$0x1] %vm206_vm6, %v596_v17  ;;  %v532_v18 = vld [vmem:[%s750_s0 + $0x1] ss:$2 sm:$0xff] }
   0x6   :  { %50 = vrot.lane.b32.xlu0 %v520_v2, %s593_s17  ;;  %58 = vrot.lane.b32.xlu1 %v522_v3, %s594_s18  ;;  %v375_v19 = vld [vmem:[%s752_s7] sm:$0xf]  ;;  %v241_v56 = vld [vmem:[%s755_s4 + $0x8] sm:$0xff]  ;;  %vm243_vm8 = vcmask 195584  }
   0x7   :  { %574 = vmatprep.subr.msk.bf16.mxu0 %vm573_vm2, %v572_v6  ;;  %v533_v20 = vld [vmem:[%s750_s0 + $0x19] ss:$2 sm:$0xff]  ;;  %v526_v51 = vld [vmem:[%s753_s2] ss:$0 sm:$0xff] }
   0x8   :  { %577 = vmatpush3.bf16.msk.msra.mxu0 %vm573_vm2, %v572_v6  ;;  %v527_v54 = vld [vmem:[%s754_s3] ss:$0 sm:$0xff]  ;;  %s597_s3 = smov 16  }
   0x9   :  { %567 = vmatprep.subr.msk.mxu0 %vm77_vm0, %v375_v19  ;;  %v240_v55 = vld [vmem:[%s755_s4] sm:$0xff] }
   0xa   :  { %v578_v59 = vpack.c.bf16 %v241_v56, %v240_v55 }
   0xc   :  { %579 = vmatprep.subr.bf16.mxu1 %v578_v59 }
   0xd   :  { %581 = vmatpush3.bf16.msra.mxu1 %v578_v59 }
   0xe   :  { %562 = vmatprep.subr.mxu1 %v242_v0 }
  0x11   :  { %563 = vmatpush3.msra.mxu1 %v242_v0 }
  0x74   :  { %v49_v8 = vpop.permute.xlu0 %48  ;;  %v57_v9 = vpop.permute.xlu1 %56 }
  0x75   :  { %v63_v10 = vsel %vm62_vm3, %v35_v7, %v49_v8 }
  0x76   :  { %v66_v11 = vsel %vm65_vm4, %v63_v10, %v57_v9 }
  0x77   :  { %555 = vmatprep.mubr.msk.f32.mxu0 %vm70_vm5, %v66_v11 }
  0x78   :  { %v51_v13 = vpop.permute.xlu0 %50  ;;  %v59_v14 = vpop.permute.xlu1 %58 }
  0x79   :  { %v64_v15 = vsel %vm62_vm3, %v518_v12, %v51_v13 }
  0x7a   :  { %v67_v16 = vsel %vm65_vm4, %v64_v15, %v59_v14 }
  0x7b   :  { %556 = vmatmul.mubr.msk.f32.vlgmr.msra.gmra.mrb[0].mxu0 %vm70_vm5, %v67_v16 }
  0x7c   :  { %569 = vmatprep.mubr.msk.f32.mxu0 %vm62_vm3, %v532_v18  ;;  %568 = vmatpush3.msk.msra.mxu0 %vm77_vm0, %v375_v19 }
  0x7f   :  { %570 = vmatmul.mubr.msk.f32.vlgmr.msra.gmra.mrb[2].mxu0 %vm62_vm3, %v533_v20 }
 0x14e   :  { %v557_v21 = vpop.f32.mrb[0].mxu0 }
 0x14f   :  { %v159_v22 = vsel %vm65_vm4, %v557_v21, 0.0  ;;  %v168_v23 = vmul.f32 %v557_v21, %v557_v21  ;;  %v147_v24 = vpop.f32.mrb[1].mxu0 }
 0x150   :  { %v158_v25 = vsel %vm65_vm4, %v147_v24, 0.0  ;;  %v167_v26 = vmul.f32 %v147_v24, %v147_v24 }
 0x151   :  { %v170_v27 = vsel %vm65_vm4, %v168_v23, 0.0  ;;  %v160_v28 = vadd.f32 %v159_v22, %v158_v25 }
 0x152   :  { %v169_v29 = vsel %vm65_vm4, %v167_v26, 0.0  ;;  %v571_v5 = vpop.f32.mrb[2].mxu0 }
 0x153   :  { %v161_v30 = vrot.slane %v160_v28, 4  ;;  %v171_v31 = vadd.f32 %v170_v27, %v169_v29  ;;  %v463_v6 = vsel %vm65_vm4, %v571_v5, 0.0  ;;  %v472_v7 = vmul.f32 %v571_v5, %v571_v5  ;;  %v451_v8 = vpop.f32.mrb[3].mxu0 }
 0x154   :  { %v462_v9 = vsel %vm65_vm4, %v451_v8, 0.0  ;;  %v471_v10 = vmul.f32 %v451_v8, %v451_v8 }
 0x155   :  { %v162_v32 = vadd.f32 %v161_v30, %v160_v28  ;;  %v172_v33 = vrot.slane %v171_v31, 4  ;;  %v474_v11 = vsel %vm65_vm4, %v472_v7, 0.0  ;;  %v464_v12 = vadd.f32 %v463_v6, %v462_v9 }
 0x156   :  { %v473_v13 = vsel %vm65_vm4, %v471_v10, 0.0 }
 0x157   :  { %v163_v34 = vrot.slane %v162_v32, 2  ;;  %v173_v35 = vadd.f32 %v172_v33, %v171_v31  ;;  %v465_v14 = vrot.slane %v464_v12, 4  ;;  %v475_v15 = vadd.f32 %v474_v11, %v473_v13 }
 0x159   :  { %v164_v36 = vadd.f32 %v163_v34, %v162_v32  ;;  %v174_v37 = vrot.slane %v173_v35, 2  ;;  %v466_v16 = vadd.f32 %v465_v14, %v464_v12  ;;  %v476_v17 = vrot.slane %v475_v15, 4  ;;  %v537_v12 = vld [vmem:[%s756_s8] ss:$0 sm:$0xff] }
 0x15a   :  { %v530_v14 = vld [vmem:[%s757_s5] ss:$0 sm:$0xff] }
 0x15b   :  { %v165_v38 = vrot.slane %v164_v36, 1  ;;  %v175_v39 = vadd.f32 %v174_v37, %v173_v35  ;;  %v467_v18 = vrot.slane %v466_v16, 2  ;;  %v477_v19 = vadd.f32 %v476_v17, %v475_v15 }
 0x15d   :  { %v166_v40 = vadd.f32 %v165_v38, %v164_v36  ;;  %v176_v41 = vrot.slane %v175_v39, 1  ;;  %v468_v20 = vadd.f32 %v467_v18, %v466_v16 }
 0x15f   :  { %v177_v42 = vadd.f32 %v176_v41, %v175_v39  ;;  %v178_v43 = vmul.f32 0.0625, %v166_v40  ;;  %v469_v22 = vrot.slane %v468_v20, 1 }
 0x161   :  { %v179_v44 = vmul.f32 0.0625, %v177_v42  ;;  %v180_v45 = vmul.f32 %v178_v43, %v178_v43  ;;  %v182_v46 = vsub.f32 %v147_v24, %v178_v43  ;;  %v183_v47 = vsub.f32 %v557_v21, %v178_v43 }
 0x162   :  { %v478_v21 = vrot.slane %v477_v19, 2  ;;  %v470_v24 = vadd.f32 %v469_v22, %v468_v20  ;;  %v531_v20 = vld [vmem:[%s759_s6] ss:$0 sm:$0xff] }
 0x163   :  { %v181_v48 = vsub.f32 %v179_v44, %v180_v45 }
 0x164   :  { %v479_v23 = vadd.f32 %v478_v21, %v477_v19  ;;  %v482_v27 = vmul.f32 0.0625, %v470_v24  ;;  %v538_v19 = vld [vmem:[%s758_s9] ss:$0 sm:$0xff] }
 0x165   :  { %v184_v49 = vadd.f32 1e-05, %v181_v48 }
 0x166   :  { %v480_v25 = vrot.slane %v479_v23, 1  ;;  %v484_v29 = vmul.f32 %v482_v27, %v482_v27  ;;  %v486_v30 = vsub.f32 %v451_v8, %v482_v27  ;;  %v487_v31 = vsub.f32 %v571_v5, %v482_v27 }
 0x167   :  { %587 = vrsqrt.f32 %v184_v49 }
 0x168   :  { %v481_v26 = vadd.f32 %v480_v25, %v479_v23 }
 0x16a   :  { %v483_v28 = vmul.f32 0.0625, %v481_v26 }
 0x16c   :  { %v485_v32 = vsub.f32 %v483_v28, %v484_v29 }
 0x16e   :  { %v488_v35 = vadd.f32 1e-05, %v485_v32 }
 0x170   :  { %589 = vrsqrt.f32 %v488_v35 }
 0x171   :  { %v588_v50 = vpop.eup %587 }
 0x172   :  { %v186_v52 = vmul.f32 %v588_v50, %v182_v46  ;;  %v187_v53 = vmul.f32 %v588_v50, %v183_v47 }
 0x174   :  { %v194_v57 = vmul.f32 %v526_v51, %v186_v52  ;;  %v195_v58 = vmul.f32 %v526_v51, %v187_v53 }
 0x176   :  { %v202_v60 = vadd.f32 %v527_v54, %v194_v57  ;;  %v203_v61 = vadd.f32 %v527_v54, %v195_v58 }
 0x178   :  { %v204_v62 = vmax.f32 %v202_v60, 0.0  ;;  %v205_v63 = vmax.f32 %v203_v61, 0.0 }
 0x17a   :  { %211 = vst.msk [vmem:[#allocation2 + $0x1] sm:$0xff] %vm65_vm4, %v204_v62  ;;  %212 = vst.msk [vmem:[#allocation2 + $0x11] sm:$0xff] %vm65_vm4, %v205_v63  ;;  %v590_v44 = vpop.eup %589 }
 0x17b   :  { %v490_v45 = vmul.f32 %v590_v44, %v486_v30  ;;  %v491_v46 = vmul.f32 %v590_v44, %v487_v31 }
 0x17d   :  { %v498_v15 = vmul.f32 %v537_v12, %v490_v45  ;;  %v499_v16 = vmul.f32 %v537_v12, %v491_v46 }
 0x17f   :  { %v506_v23 = vadd.f32 %v538_v19, %v498_v15  ;;  %v507_v24 = vadd.f32 %v538_v19, %v499_v16 }
 0x181   :  { %v216_v1 = vld [vmem:[#allocation2 + $0x11] sm:$0xff]  ;;  %v215_v2 = vld [vmem:[#allocation2 + $0x1] sm:$0xff] }
 0x182   :  { %223 = vrot.lane.b32.xlu1 %v216_v1, %s594_s18  ;;  %221 = vrot.lane.b32.xlu0 %v215_v2, %s594_s18  ;;  %v218_v3 = vld [vmem:[#allocation2 + $0x12] sm:$0xff]  ;;  %v217_v4 = vld [vmem:[#allocation2 + $0x2] sm:$0xff] }
 0x183   :  { %v214_v36 = vld [vmem:[#allocation2 + $0x10] sm:$0xff]  ;;  %v213_v37 = vld [vmem:[#allocation2] sm:$0xff] }
 0x186   :  { %231 = vrot.lane.b32.xlu1 %v218_v3, %s597_s3  ;;  %229 = vrot.lane.b32.xlu0 %v217_v4, %s597_s3 }
 0x1f4   :  { %v224_v33 = vpop.permute.xlu1 %223  ;;  %v222_v34 = vpop.permute.xlu0 %221 }
 0x1f5   :  { %v236_v38 = vsel %vm65_vm4, %v214_v36, %v224_v33  ;;  %v235_v39 = vsel %vm65_vm4, %v213_v37, %v222_v34 }
 0x1f8   :  { %v232_v40 = vpop.permute.xlu1 %231  ;;  %v230_v41 = vpop.permute.xlu0 %229 }
 0x1f9   :  { %v239_v42 = vsel %vm237_vm7, %v236_v38, %v232_v40  ;;  %v238_v43 = vsel %vm237_vm7, %v235_v39, %v230_v41 }
 0x1fa   :  { %564 = vmatprep.mubr.msk.f32.mxu1 %vm243_vm8, %v238_v43 }
 0x1fb   :  { %565 = vmatmul.mubr.msk.f32.vlgmr.msra.gmra.mrb[0].mxu1 %vm243_vm8, %v239_v42 }
 0x2ce   :  { %v566_v47 = vpop.f32.mrb[0].mxu1 }
 0x2cf   :  { %v328_v48 = vsel %vm65_vm4, %v566_v47, 0.0  ;;  %v337_v49 = vmul.f32 %v566_v47, %v566_v47  ;;  %v316_v50 = vpop.f32.mrb[1].mxu1 }
 0x2d0   :  { %v327_v51 = vsel %vm65_vm4, %v316_v50, 0.0  ;;  %v336_v52 = vmul.f32 %v316_v50, %v316_v50 }
 0x2d1   :  { %v339_v53 = vsel %vm65_vm4, %v337_v49, 0.0  ;;  %v329_v54 = vadd.f32 %v328_v48, %v327_v51 }
 0x2d2   :  { %v338_v55 = vsel %vm65_vm4, %v336_v52, 0.0 }
 0x2d3   :  { %v330_v56 = vrot.slane %v329_v54, 4  ;;  %v340_v57 = vadd.f32 %v339_v53, %v338_v55 }
 0x2d5   :  { %v331_v58 = vadd.f32 %v330_v56, %v329_v54  ;;  %v341_v59 = vrot.slane %v340_v57, 4 }
 0x2d7   :  { %v332_v60 = vrot.slane %v331_v58, 2  ;;  %v342_v61 = vadd.f32 %v341_v59, %v340_v57 }
 0x2d9   :  { %v333_v62 = vadd.f32 %v332_v60, %v331_v58  ;;  %v343_v63 = vrot.slane %v342_v61, 2 }
 0x2db   :  { %v334_v0 = vrot.slane %v333_v62, 1  ;;  %v344_v1 = vadd.f32 %v343_v63, %v342_v61 }
 0x2dd   :  { %v335_v2 = vadd.f32 %v334_v0, %v333_v62  ;;  %v345_v3 = vrot.slane %v344_v1, 1 }
 0x2df   :  { %v346_v4 = vadd.f32 %v345_v3, %v344_v1  ;;  %v347_v5 = vmul.f32 0.0625, %v335_v2 }
 0x2e1   :  { %v348_v6 = vmul.f32 0.0625, %v346_v4  ;;  %v349_v7 = vmul.f32 %v347_v5, %v347_v5  ;;  %v351_v8 = vsub.f32 %v316_v50, %v347_v5  ;;  %v352_v9 = vsub.f32 %v566_v47, %v347_v5 }
 0x2e3   :  { %v350_v10 = vsub.f32 %v348_v6, %v349_v7 }
 0x2e5   :  { %v353_v11 = vadd.f32 1e-05, %v350_v10 }
 0x2e7   :  { %591 = vrsqrt.f32 %v353_v11 }
 0x2f1   :  { %v592_v13 = vpop.eup %591 }
 0x2f2   :  { %v355_v17 = vmul.f32 %v592_v13, %v351_v8  ;;  %v356_v18 = vmul.f32 %v592_v13, %v352_v9 }
 0x2f4   :  { %v363_v21 = vmul.f32 %v530_v14, %v355_v17  ;;  %v364_v22 = vmul.f32 %v530_v14, %v356_v18 }
 0x2f6   :  { %v371_v25 = vadd.f32 %v531_v20, %v363_v21  ;;  %v372_v26 = vadd.f32 %v531_v20, %v364_v22 }
 0x2f8   :  { %v508_v27 = vadd.f32 %v506_v23, %v371_v25  ;;  %v509_v28 = vadd.f32 %v507_v24, %v372_v26 }
 0x2fa   :  { %v510_v29 = vmax.f32 %v508_v27, 0.0  ;;  %v511_v30 = vmax.f32 %v509_v28, 0.0 }
 0x2fc   :  { %512 = vst.msk [vmem:[%s760_s10] sm:$0xff] %vm65_vm4, %v510_v29  ;;  %513 = vst.msk [vmem:[%s760_s10 + $0x8] sm:$0xff] %vm65_vm4, %v511_v30 }

</bundles_post_ra>
